<compile_context>
chip_gen: v7x
topology: tpu7x:2x2x1
jax: 0.10.0
libtpu: 0.0.40
codegen_flags: <defaults>
</compile_context>

<pallas_src>
import functools

import jax
import jax.numpy as jnp
from jax.experimental import pallas as pl
from jax.experimental.pallas import tpu as pltpu


# ---------------------------------------------------------------------------
# Pallas kernel: fused forward pass (embed(x) + embed(x') + head) per tile
# ---------------------------------------------------------------------------
def _gmk_kernel(x_ref, xp_ref,
                w1, b1, w2, b2, w3, b3, w4, b4, w5, b5,
                wha, whb, bh1, wh2r, bh2,
                o_ref, *, tile):
    f32 = jnp.float32
    bf16 = jnp.bfloat16

    def dense_relu(h_bf16, w_ref, b_ref):
        # bf16 operands on the MXU, f32 accumulate + bias + ReLU, bf16 carry.
        z = jnp.dot(h_bf16, w_ref[...], preferred_element_type=f32) + b_ref[...]
        return jnp.maximum(z, 0.0).astype(bf16)

    # Fused embed over [x_tile ; x_prime_tile]: build the (2*tile, W) block
    # in VMEM/vregs (the HBM pack copy was removed from the wrapper).
    h = jnp.concatenate([x_ref[...], xp_ref[...]], axis=0).astype(bf16)
    h = dense_relu(h, w1, b1)
    h = dense_relu(h, w2, b2)
    h = dense_relu(h, w3, b3)
    h = dense_relu(h, w4, b4)
    h = dense_relu(h, w5, b5)                    # (2*tile, latent), bf16

    e1 = h[:tile]                                # embed(x), static 8-aligned slice
    e2 = h[tile:]                                # embed(x_prime)

    # head layer 0: cat([e1, e2]) @ Wh0 == e1 @ Wh0[:latent] + e2 @ Wh0[latent:]
    hh = (jnp.dot(e1, wha[...], preferred_element_type=f32)
          + jnp.dot(e2, whb[...], preferred_element_type=f32)
          + bh1[...])
    hh = jnp.maximum(hh, 0.0)                    # (tile, 30), f32

    # head layer 1: Linear(30, 1) as a VPU multiply + lane reduction (an N=1
    # MXU matmul would fill <1% of a tile), landing in a lane-dense row.
    out = jnp.sum(hh * wh2r[...], axis=-1)       # (tile,)
    res = out.reshape(1, tile) + bh2[...]        # (1, tile)
    o_ref[...] = res.reshape(1, 1, tile).astype(o_ref.dtype)


# ---------------------------------------------------------------------------
# Parameter construction (deterministic, PyTorch-Linear-style uniform init)
# ---------------------------------------------------------------------------
def init_params(key, input_dim, latent_dim=50, dtype=jnp.float32):
    dims_embed = [(input_dim, 200), (200, 200), (200, 200), (200, 100),
                  (100, latent_dim)]
    dims_head = [(2 * latent_dim, 30), (30, 1)]
    params = {}
    keys = jax.random.split(key, 2 * (len(dims_embed) + len(dims_head)))
    ki = 0

    def linear(fan_in, fan_out):
        nonlocal ki
        bound = 1.0 / jnp.sqrt(jnp.asarray(fan_in, jnp.float32))
        w = jax.random.uniform(keys[ki], (fan_in, fan_out), dtype, -bound, bound)
        b = jax.random.uniform(keys[ki + 1], (1, fan_out), dtype, -bound, bound)
        ki += 2
        return w, b

    for i, (fi, fo) in enumerate(dims_embed):
        params[f"e{i}_w"], params[f"e{i}_b"] = linear(fi, fo)
    for i, (fi, fo) in enumerate(dims_head):
        params[f"h{i}_w"], params[f"h{i}_b"] = linear(fi, fo)
    return params


# ---------------------------------------------------------------------------
# Wrapper: broadcast / pad in plain JAX, hot path in the kernel
# ---------------------------------------------------------------------------
def _round_up(n, m):
    return ((n + m - 1) // m) * m


@functools.partial(jax.jit, static_argnames=("tile",))
def global_metric_kernel(params, x, x_prime, tile=2048):
    x, x_prime = jnp.broadcast_arrays(x, x_prime)
    *b, W = x.shape
    xf = x.reshape(-1, W)
    xpf = x_prime.reshape(-1, W)
    n = xf.shape[0]

    # Static tile (sweepable; 2048 is safe on v5e/v6e/v7x VMEM budgets).
    # Cap by the sublane-rounded batch so tiny inputs are not padded to a
    # full block.
    tile = _round_up(min(tile, _round_up(n, 8)), 8)
    # v7x megacore guard: if everything fits in one block but the block is
    # big enough to be worth splitting, halve it so grid >= 2 and
    # ("parallel",) can shard across both TensorCores.  (No-op on v5e/v6e.)
    if n <= tile and tile >= 512:
        tile = _round_up((n + 1) // 2, 8)

    n_pad = _round_up(n, tile)
    if n_pad != n:
        pad = ((0, n_pad - n), (0, 0))
        xf = jnp.pad(xf, pad)
        xpf = jnp.pad(xpf, pad)
    n_blocks = n_pad // tile

    latent = params["e4_w"].shape[1]
    bf16 = jnp.bfloat16
    f32 = jnp.float32
    wh = params["h0_w"]

    weight_args = [
        params["e0_w"].astype(bf16), params["e0_b"].astype(f32),
        params["e1_w"].astype(bf16), params["e1_b"].astype(f32),
        params["e2_w"].astype(bf16), params["e2_b"].astype(f32),
        params["e3_w"].astype(bf16), params["e3_b"].astype(f32),
        params["e4_w"].astype(bf16), params["e4_b"].astype(f32),
        wh[:latent].astype(bf16),                       # head-0 weight, x half
        wh[latent:].astype(bf16),                       # head-0 weight, x' half
        params["h0_b"].astype(f32),
        params["h1_w"].reshape(1, -1).astype(f32),      # (1, 30) row for VPU mul+reduce
        params["h1_b"].reshape(1, 1).astype(f32),
    ]

    # x and x' stream in as two independent row-tiled inputs; the fused
    # (2*tile, W) block is assembled inside the kernel (no HBM pack copy).
    row_spec = pl.BlockSpec((tile, W), lambda i: (i, 0))
    weight_specs = [pl.BlockSpec(a.shape, lambda i: (0, 0)) for a in weight_args]

    out = pl.pallas_call(
        functools.partial(_gmk_kernel, tile=tile),
        out_shape=jax.ShapeDtypeStruct((n_blocks, 1, tile), x.dtype),
        grid_spec=pltpu.PrefetchScalarGridSpec(
            num_scalar_prefetch=0,
            grid=(n_blocks,),
            in_specs=[row_spec, row_spec] + weight_specs,
            out_specs=pl.BlockSpec((1, 1, tile), lambda i: (i, 0, 0)),
        ),
        compiler_params=pltpu.CompilerParams(
            dimension_semantics=("parallel",)),
    )(xf, xpf, *weight_args)

    return out.reshape(-1)[:n].reshape(*b, 1)


# ---------------------------------------------------------------------------
# Pure-JAX f32 reference (for a correctness check)
# ---------------------------------------------------------------------------
def _ref_forward(params, x, x_prime):
    x, x_prime = jnp.broadcast_arrays(x, x_prime)
    *b, W = x.shape

    def embed(v):
        h = v
        for i in range(5):
            h = jnp.maximum(h @ params[f"e{i}_w"] + params[f"e{i}_b"], 0.0)
        return h

    e = jnp.concatenate([embed(x.reshape(-1, W)), embed(x_prime.reshape(-1, W))],
                        axis=-1)
    h = jnp.maximum(e @ params["h0_w"] + params["h0_b"], 0.0)
    out = h @ params["h1_w"] + params["h1_b"]
    return out.reshape(*b, 1)


if __name__ == "__main__":
    key = jax.random.PRNGKey(0)
    k_param, k_x, k_xp, k_x2, k_xp2 = jax.random.split(key, 5)

    input_dim = 16
    latent_dim = 50
    params = init_params(k_param, input_dim, latent_dim)

    # --- test 1: small shapes with broadcasting: x (2,4,16), x' (4,16) ------
    x = jax.random.normal(k_x, (2, 4, input_dim), jnp.float32)
    x_prime = jax.random.normal(k_xp, (4, input_dim), jnp.float32)
    out = jax.block_until_ready(global_metric_kernel(params, x, x_prime))
    ref = _ref_forward(params, x, x_prime)
    assert out.shape == (2, 4, 1), out.shape
    assert jnp.allclose(out, ref, atol=2e-2, rtol=2e-2), \
        float(jnp.max(jnp.abs(out - ref)))

    # --- test 2: larger batch exercising padding, tile split, and grid > 1 --
    x2 = jax.random.normal(k_x2, (3, 200, input_dim), jnp.float32)
    xp2 = jax.random.normal(k_xp2, (1, 200, input_dim), jnp.float32)
    out2 = jax.block_until_ready(global_metric_kernel(params, x2, xp2))
    ref2 = _ref_forward(params, x2, xp2)
    assert out2.shape == (3, 200, 1), out2.shape
    assert jnp.allclose(out2, ref2, atol=2e-2, rtol=2e-2), \
        float(jnp.max(jnp.abs(out2 - ref2)))

    print("KERNEL_OK")
</pallas_src>

<mosaic_0001>
module attributes {stable_mosaic.version = 11 : i64} {
  func.func @_gmk_kernel(%arg0: i32, %arg1: memref<8x16xf32, #tpu.memory_space<vmem>>, %arg2: memref<8x16xf32, #tpu.memory_space<vmem>>, %arg3: memref<16x200xbf16, #tpu.memory_space<vmem>>, %arg4: memref<1x200xf32, #tpu.memory_space<vmem>>, %arg5: memref<200x200xbf16, #tpu.memory_space<vmem>>, %arg6: memref<1x200xf32, #tpu.memory_space<vmem>>, %arg7: memref<200x200xbf16, #tpu.memory_space<vmem>>, %arg8: memref<1x200xf32, #tpu.memory_space<vmem>>, %arg9: memref<200x100xbf16, #tpu.memory_space<vmem>>, %arg10: memref<1x100xf32, #tpu.memory_space<vmem>>, %arg11: memref<100x50xbf16, #tpu.memory_space<vmem>>, %arg12: memref<1x50xf32, #tpu.memory_space<vmem>>, %arg13: memref<50x30xbf16, #tpu.memory_space<vmem>>, %arg14: memref<50x30xbf16, #tpu.memory_space<vmem>>, %arg15: memref<1x30xf32, #tpu.memory_space<vmem>>, %arg16: memref<1x30xf32, #tpu.memory_space<vmem>>, %arg17: memref<1x1xf32, #tpu.memory_space<vmem>>, %arg18: memref<1x1x8xf32, #tpu.memory_space<vmem>>) attributes {dimension_semantics = [#tpu.dimension_semantics<parallel>], iteration_bounds = array<i64: 1>, scalar_prefetch = 0 : i64, scratch_operands = 0 : i64, tpu.core_type = #tpu.core_type<tc>, window_params = [{transform_indices = @transform_0, window_bounds = array<i64: 8, 16>}, {transform_indices = @transform_1, window_bounds = array<i64: 8, 16>}, {pipeline_mode = #tpu.pipeline_mode<synchronous>, transform_indices = @transform_2, window_bounds = array<i64: 16, 200>}, {pipeline_mode = #tpu.pipeline_mode<synchronous>, transform_indices = @transform_3, window_bounds = array<i64: 1, 200>}, {pipeline_mode = #tpu.pipeline_mode<synchronous>, transform_indices = @transform_4, window_bounds = array<i64: 200, 200>}, {pipeline_mode = #tpu.pipeline_mode<synchronous>, transform_indices = @transform_5, window_bounds = array<i64: 1, 200>}, {pipeline_mode = #tpu.pipeline_mode<synchronous>, transform_indices = @transform_6, window_bounds = array<i64: 200, 200>}, {pipeline_mode = #tpu.pipeline_mode<synchronous>, transform_indices = @transform_7, window_bounds = array<i64: 1, 200>}, {pipeline_mode = #tpu.pipeline_mode<synchronous>, transform_indices = @transform_8, window_bounds = array<i64: 200, 100>}, {pipeline_mode = #tpu.pipeline_mode<synchronous>, transform_indices = @transform_9, window_bounds = array<i64: 1, 100>}, {pipeline_mode = #tpu.pipeline_mode<synchronous>, transform_indices = @transform_10, window_bounds = array<i64: 100, 50>}, {pipeline_mode = #tpu.pipeline_mode<synchronous>, transform_indices = @transform_11, window_bounds = array<i64: 1, 50>}, {pipeline_mode = #tpu.pipeline_mode<synchronous>, transform_indices = @transform_12, window_bounds = array<i64: 50, 30>}, {pipeline_mode = #tpu.pipeline_mode<synchronous>, transform_indices = @transform_13, window_bounds = array<i64: 50, 30>}, {pipeline_mode = #tpu.pipeline_mode<synchronous>, transform_indices = @transform_14, window_bounds = array<i64: 1, 30>}, {pipeline_mode = #tpu.pipeline_mode<synchronous>, transform_indices = @transform_15, window_bounds = array<i64: 1, 30>}, {pipeline_mode = #tpu.pipeline_mode<synchronous>, transform_indices = @transform_16, window_bounds = array<i64: 1, 1>}, {transform_indices = @transform_17, window_bounds = array<i64: 1, 1, 8>}]} {
    %c0 = arith.constant 0 : index
    %c0_0 = arith.constant 0 : index
    %0 = vector.load %arg1[%c0, %c0_0] : memref<8x16xf32, #tpu.memory_space<vmem>>, vector<8x16xf32>
    %c0_1 = arith.constant 0 : index
    %c0_2 = arith.constant 0 : index
    %1 = vector.load %arg2[%c0_1, %c0_2] : memref<8x16xf32, #tpu.memory_space<vmem>>, vector<8x16xf32>
    %2 = tpu.concatenate %0, %1 in 0 : vector<8x16xf32>, vector<8x16xf32> -> vector<16x16xf32>
    %3 = arith.truncf %2 : vector<16x16xf32> to vector<16x16xbf16>
    %c0_3 = arith.constant 0 : index
    %c0_4 = arith.constant 0 : index
    %4 = vector.load %arg3[%c0_3, %c0_4] : memref<16x200xbf16, #tpu.memory_space<vmem>>, vector<16x200xbf16>
    %cst = arith.constant dense<0.000000e+00> : vector<16x200xf32>
    %5 = tpu.matmul %3, %4, %cst {dimension_numbers = #tpu.dot_dimension_numbers<[1], [0], [0], [1], [0, 0, 1, 1], [], []>} : vector<16x16xbf16>, vector<16x200xbf16>, vector<16x200xf32> -> vector<16x200xf32>
    %c0_5 = arith.constant 0 : index
    %c0_6 = arith.constant 0 : index
    %6 = vector.load %arg4[%c0_5, %c0_6] : memref<1x200xf32, #tpu.memory_space<vmem>>, vector<1x200xf32>
    %7 = vector.broadcast %6 : vector<1x200xf32> to vector<16x200xf32>
    %8 = arith.addf %5, %7 : vector<16x200xf32>
    %cst_7 = arith.constant 0.000000e+00 : f32
    %9 = vector.broadcast %cst_7 : f32 to vector<16x200xf32>
    %10 = arith.maximumf %8, %9 : vector<16x200xf32>
    %11 = arith.truncf %10 : vector<16x200xf32> to vector<16x200xbf16>
    %c0_8 = arith.constant 0 : index
    %c0_9 = arith.constant 0 : index
    %12 = vector.load %arg5[%c0_8, %c0_9] : memref<200x200xbf16, #tpu.memory_space<vmem>>, vector<200x200xbf16>
    %cst_10 = arith.constant dense<0.000000e+00> : vector<16x200xf32>
    %13 = tpu.matmul %11, %12, %cst_10 {dimension_numbers = #tpu.dot_dimension_numbers<[1], [0], [0], [1], [0, 0, 1, 1], [], []>} : vector<16x200xbf16>, vector<200x200xbf16>, vector<16x200xf32> -> vector<16x200xf32>
    %c0_11 = arith.constant 0 : index
    %c0_12 = arith.constant 0 : index
    %14 = vector.load %arg6[%c0_11, %c0_12] : memref<1x200xf32, #tpu.memory_space<vmem>>, vector<1x200xf32>
    %15 = vector.broadcast %14 : vector<1x200xf32> to vector<16x200xf32>
    %16 = arith.addf %13, %15 : vector<16x200xf32>
    %cst_13 = arith.constant 0.000000e+00 : f32
    %17 = vector.broadcast %cst_13 : f32 to vector<16x200xf32>
    %18 = arith.maximumf %16, %17 : vector<16x200xf32>
    %19 = arith.truncf %18 : vector<16x200xf32> to vector<16x200xbf16>
    %c0_14 = arith.constant 0 : index
    %c0_15 = arith.constant 0 : index
    %20 = vector.load %arg7[%c0_14, %c0_15] : memref<200x200xbf16, #tpu.memory_space<vmem>>, vector<200x200xbf16>
    %cst_16 = arith.constant dense<0.000000e+00> : vector<16x200xf32>
    %21 = tpu.matmul %19, %20, %cst_16 {dimension_numbers = #tpu.dot_dimension_numbers<[1], [0], [0], [1], [0, 0, 1, 1], [], []>} : vector<16x200xbf16>, vector<200x200xbf16>, vector<16x200xf32> -> vector<16x200xf32>
    %c0_17 = arith.constant 0 : index
    %c0_18 = arith.constant 0 : index
    %22 = vector.load %arg8[%c0_17, %c0_18] : memref<1x200xf32, #tpu.memory_space<vmem>>, vector<1x200xf32>
    %23 = vector.broadcast %22 : vector<1x200xf32> to vector<16x200xf32>
    %24 = arith.addf %21, %23 : vector<16x200xf32>
    %cst_19 = arith.constant 0.000000e+00 : f32
    %25 = vector.broadcast %cst_19 : f32 to vector<16x200xf32>
    %26 = arith.maximumf %24, %25 : vector<16x200xf32>
    %27 = arith.truncf %26 : vector<16x200xf32> to vector<16x200xbf16>
    %c0_20 = arith.constant 0 : index
    %c0_21 = arith.constant 0 : index
    %28 = vector.load %arg9[%c0_20, %c0_21] : memref<200x100xbf16, #tpu.memory_space<vmem>>, vector<200x100xbf16>
    %cst_22 = arith.constant dense<0.000000e+00> : vector<16x100xf32>
    %29 = tpu.matmul %27, %28, %cst_22 {dimension_numbers = #tpu.dot_dimension_numbers<[1], [0], [0], [1], [0, 0, 1, 1], [], []>} : vector<16x200xbf16>, vector<200x100xbf16>, vector<16x100xf32> -> vector<16x100xf32>
    %c0_23 = arith.constant 0 : index
    %c0_24 = arith.constant 0 : index
    %30 = vector.load %arg10[%c0_23, %c0_24] : memref<1x100xf32, #tpu.memory_space<vmem>>, vector<1x100xf32>
    %31 = vector.broadcast %30 : vector<1x100xf32> to vector<16x100xf32>
    %32 = arith.addf %29, %31 : vector<16x100xf32>
    %cst_25 = arith.constant 0.000000e+00 : f32
    %33 = vector.broadcast %cst_25 : f32 to vector<16x100xf32>
    %34 = arith.maximumf %32, %33 : vector<16x100xf32>
    %35 = arith.truncf %34 : vector<16x100xf32> to vector<16x100xbf16>
    %c0_26 = arith.constant 0 : index
    %c0_27 = arith.constant 0 : index
    %36 = vector.load %arg11[%c0_26, %c0_27] : memref<100x50xbf16, #tpu.memory_space<vmem>>, vector<100x50xbf16>
    %cst_28 = arith.constant dense<0.000000e+00> : vector<16x50xf32>
    %37 = tpu.matmul %35, %36, %cst_28 {dimension_numbers = #tpu.dot_dimension_numbers<[1], [0], [0], [1], [0, 0, 1, 1], [], []>} : vector<16x100xbf16>, vector<100x50xbf16>, vector<16x50xf32> -> vector<16x50xf32>
    %c0_29 = arith.constant 0 : index
    %c0_30 = arith.constant 0 : index
    %38 = vector.load %arg12[%c0_29, %c0_30] : memref<1x50xf32, #tpu.memory_space<vmem>>, vector<1x50xf32>
    %39 = vector.broadcast %38 : vector<1x50xf32> to vector<16x50xf32>
    %40 = arith.addf %37, %39 : vector<16x50xf32>
    %cst_31 = arith.constant 0.000000e+00 : f32
    %41 = vector.broadcast %cst_31 : f32 to vector<16x50xf32>
    %42 = arith.maximumf %40, %41 : vector<16x50xf32>
    %43 = arith.truncf %42 : vector<16x50xf32> to vector<16x50xbf16>
    %44 = vector.extract_strided_slice %43 {offsets = [0, 0], sizes = [8, 50], strides = [1, 1]} : vector<16x50xbf16> to vector<8x50xbf16>
    %45 = vector.extract_strided_slice %43 {offsets = [8, 0], sizes = [8, 50], strides = [1, 1]} : vector<16x50xbf16> to vector<8x50xbf16>
    %c0_32 = arith.constant 0 : index
    %c0_33 = arith.constant 0 : index
    %46 = vector.load %arg13[%c0_32, %c0_33] : memref<50x30xbf16, #tpu.memory_space<vmem>>, vector<50x30xbf16>
    %cst_34 = arith.constant dense<0.000000e+00> : vector<8x30xf32>
    %47 = tpu.matmul %44, %46, %cst_34 {dimension_numbers = #tpu.dot_dimension_numbers<[1], [0], [0], [1], [0, 0, 1, 1], [], []>} : vector<8x50xbf16>, vector<50x30xbf16>, vector<8x30xf32> -> vector<8x30xf32>
    %c0_35 = arith.constant 0 : index
    %c0_36 = arith.constant 0 : index
    %48 = vector.load %arg14[%c0_35, %c0_36] : memref<50x30xbf16, #tpu.memory_space<vmem>>, vector<50x30xbf16>
    %cst_37 = arith.constant dense<0.000000e+00> : vector<8x30xf32>
    %49 = tpu.matmul %45, %48, %cst_37 {dimension_numbers = #tpu.dot_dimension_numbers<[1], [0], [0], [1], [0, 0, 1, 1], [], []>} : vector<8x50xbf16>, vector<50x30xbf16>, vector<8x30xf32> -> vector<8x30xf32>
    %50 = arith.addf %47, %49 : vector<8x30xf32>
    %c0_38 = arith.constant 0 : index
    %c0_39 = arith.constant 0 : index
    %51 = vector.load %arg15[%c0_38, %c0_39] : memref<1x30xf32, #tpu.memory_space<vmem>>, vector<1x30xf32>
    %52 = vector.broadcast %51 : vector<1x30xf32> to vector<8x30xf32>
    %53 = arith.addf %50, %52 : vector<8x30xf32>
    %cst_40 = arith.constant 0.000000e+00 : f32
    %54 = vector.broadcast %cst_40 : f32 to vector<8x30xf32>
    %55 = arith.maximumf %53, %54 : vector<8x30xf32>
    %c0_41 = arith.constant 0 : index
    %c0_42 = arith.constant 0 : index
    %56 = vector.load %arg16[%c0_41, %c0_42] : memref<1x30xf32, #tpu.memory_space<vmem>>, vector<1x30xf32>
    %57 = vector.broadcast %56 : vector<1x30xf32> to vector<8x30xf32>
    %58 = arith.mulf %55, %57 : vector<8x30xf32>
    %cst_43 = arith.constant dense<0.000000e+00> : vector<8xf32>
    %59 = vector.multi_reduction <add>, %58, %cst_43 [1] : vector<8x30xf32> to vector<8xf32>
    %60 = vector.shape_cast %59 : vector<8xf32> to vector<1x8xf32>
    %c0_44 = arith.constant 0 : index
    %c0_45 = arith.constant 0 : index
    %61 = vector.load %arg17[%c0_44, %c0_45] : memref<1x1xf32, #tpu.memory_space<vmem>>, vector<1x1xf32>
    %62 = vector.broadcast %61 : vector<1x1xf32> to vector<1x8xf32>
    %63 = arith.addf %60, %62 : vector<1x8xf32>
    %64 = vector.shape_cast %63 : vector<1x8xf32> to vector<1x1x8xf32>
    %c0_46 = arith.constant 0 : index
    %c0_47 = arith.constant 0 : index
    %c0_48 = arith.constant 0 : index
    %65 = vector.load %arg18[%c0_46, %c0_47, %c0_48] : memref<1x1x8xf32, #tpu.memory_space<vmem>>, vector<1x1x8xf32>
    tpu.vector_store %arg18[%c0_46, %c0_47, %c0_48], %64 {strides = array<i32>} : memref<1x1x8xf32, #tpu.memory_space<vmem>>, vector<1x1x8xf32>,
    return
  }
  func.func @transform_0(%arg0: i32) -> (i32, i32) {
    %c0_i32 = arith.constant 0 : i32
    %c0_i32_0 = arith.constant 0 : i32
    return %arg0, %c0_i32 : i32, i32
  }
  func.func @transform_1(%arg0: i32) -> (i32, i32) {
    %c0_i32 = arith.constant 0 : i32
    %c0_i32_0 = arith.constant 0 : i32
    return %arg0, %c0_i32 : i32, i32
  }
  func.func @transform_2(%arg0: i32) -> (i32, i32) {
    %c0_i32 = arith.constant 0 : i32
    %c0_i32_0 = arith.constant 0 : i32
    %c0_i32_1 = arith.constant 0 : i32
    return %c0_i32, %c0_i32_0 : i32, i32
  }
  func.func @transform_3(%arg0: i32) -> (i32, i32) {
    %c0_i32 = arith.constant 0 : i32
    %c0_i32_0 = arith.constant 0 : i32
    %c0_i32_1 = arith.constant 0 : i32
    return %c0_i32, %c0_i32_0 : i32, i32
  }
  func.func @transform_4(%arg0: i32) -> (i32, i32) {
    %c0_i32 = arith.constant 0 : i32
    %c0_i32_0 = arith.constant 0 : i32
    %c0_i32_1 = arith.constant 0 : i32
    return %c0_i32, %c0_i32_0 : i32, i32
  }
  func.func @transform_5(%arg0: i32) -> (i32, i32) {
    %c0_i32 = arith.constant 0 : i32
    %c0_i32_0 = arith.constant 0 : i32
    %c0_i32_1 = arith.constant 0 : i32
    return %c0_i32, %c0_i32_0 : i32, i32
  }
  func.func @transform_6(%arg0: i32) -> (i32, i32) {
    %c0_i32 = arith.constant 0 : i32
    %c0_i32_0 = arith.constant 0 : i32
    %c0_i32_1 = arith.constant 0 : i32
    return %c0_i32, %c0_i32_0 : i32, i32
  }
  func.func @transform_7(%arg0: i32) -> (i32, i32) {
    %c0_i32 = arith.constant 0 : i32
    %c0_i32_0 = arith.constant 0 : i32
    %c0_i32_1 = arith.constant 0 : i32
    return %c0_i32, %c0_i32_0 : i32, i32
  }
  func.func @transform_8(%arg0: i32) -> (i32, i32) {
    %c0_i32 = arith.constant 0 : i32
    %c0_i32_0 = arith.constant 0 : i32
    %c0_i32_1 = arith.constant 0 : i32
    return %c0_i32, %c0_i32_0 : i32, i32
  }
  func.func @transform_9(%arg0: i32) -> (i32, i32) {
    %c0_i32 = arith.constant 0 : i32
    %c0_i32_0 = arith.constant 0 : i32
    %c0_i32_1 = arith.constant 0 : i32
    return %c0_i32, %c0_i32_0 : i32, i32
  }
  func.func @transform_10(%arg0: i32) -> (i32, i32) {
    %c0_i32 = arith.constant 0 : i32
    %c0_i32_0 = arith.constant 0 : i32
    %c0_i32_1 = arith.constant 0 : i32
    return %c0_i32, %c0_i32_0 : i32, i32
  }
  func.func @transform_11(%arg0: i32) -> (i32, i32) {
    %c0_i32 = arith.constant 0 : i32
    %c0_i32_0 = arith.constant 0 : i32
    %c0_i32_1 = arith.constant 0 : i32
    return %c0_i32, %c0_i32_0 : i32, i32
  }
  func.func @transform_12(%arg0: i32) -> (i32, i32) {
    %c0_i32 = arith.constant 0 : i32
    %c0_i32_0 = arith.constant 0 : i32
    %c0_i32_1 = arith.constant 0 : i32
    return %c0_i32, %c0_i32_0 : i32, i32
  }
  func.func @transform_13(%arg0: i32) -> (i32, i32) {
    %c0_i32 = arith.constant 0 : i32
    %c0_i32_0 = arith.constant 0 : i32
    %c0_i32_1 = arith.constant 0 : i32
    return %c0_i32, %c0_i32_0 : i32, i32
  }
  func.func @transform_14(%arg0: i32) -> (i32, i32) {
    %c0_i32 = arith.constant 0 : i32
    %c0_i32_0 = arith.constant 0 : i32
    %c0_i32_1 = arith.constant 0 : i32
    return %c0_i32, %c0_i32_0 : i32, i32
  }
  func.func @transform_15(%arg0: i32) -> (i32, i32) {
    %c0_i32 = arith.constant 0 : i32
    %c0_i32_0 = arith.constant 0 : i32
    %c0_i32_1 = arith.constant 0 : i32
    return %c0_i32, %c0_i32_0 : i32, i32
  }
  func.func @transform_16(%arg0: i32) -> (i32, i32) {
    %c0_i32 = arith.constant 0 : i32
    %c0_i32_0 = arith.constant 0 : i32
    %c0_i32_1 = arith.constant 0 : i32
    return %c0_i32, %c0_i32_0 : i32, i32
  }
  func.func @transform_17(%arg0: i32) -> (i32, i32, i32) {
    %c0_i32 = arith.constant 0 : i32
    %c0_i32_0 = arith.constant 0 : i32
    %c0_i32_1 = arith.constant 0 : i32
    return %arg0, %c0_i32, %c0_i32_0 : i32, i32, i32
  }
}

</mosaic_0001>

<bundles_post_ra>
// kernel: global_metric_kernel.1
= control target key start
LH: loop header
LB: loop body
LE: loop exit
PB: predicated region body
PF: predicated region fallthrough
CT: control target
= control target key end

     0   :  { %v1313_v1 = vmov 0   ;;  %vm86_vm0 = vcmask 130048   ;;  %vm305_vm1 = vcmask 1043456   ;;  %v66_v55 = vlaneseq  ;;  %s1741_s2 = inlined_call_operand.vmem [shape: bf16[16,200], index: 2, kind: input, shape index: {}]   ;;  %s1742_s0 = inlined_call_operand.vmem [shape: f32[8,16], index: 0, kind: input, shape index: {}]   ;;  %s1743_s1 = inlined_call_operand.vmem [shape: f32[8,16], index: 1, kind: input, shape index: {}]   ;;  %s1744_s4 = inlined_call_operand.vmem [shape: bf16[200,200], index: 4, kind: input, shape index: {}]   ;;  %s1745_s6 = inlined_call_operand.vmem [shape: bf16[200,200], index: 6, kind: input, shape index: {}]   ;;  %s1746_s3 = inlined_call_operand.vmem [shape: f32[1,200], index: 3, kind: input, shape index: {}]   ;;  %s1747_s8 = inlined_call_operand.vmem [shape: bf16[200,100], index: 8, kind: input, shape index: {}]   ;;  %s1748_s5 = inlined_call_operand.vmem [shape: f32[1,200], index: 5, kind: input, shape index: {}]   ;;  %s1749_s10 = inlined_call_operand.vmem [shape: bf16[100,50], index: 10, kind: input, shape index: {}]   ;;  %s1750_s7 = inlined_call_operand.vmem [shape: f32[1,200], index: 7, kind: input, shape index: {}]   ;;  %s1751_s13 = inlined_call_operand.vmem [shape: bf16[50,30], index: 13, kind: input, shape index: {}]   ;;  %s1752_s9 = inlined_call_operand.vmem [shape: f32[1,100], index: 9, kind: input, shape index: {}]   ;;  %s1753_s12 = inlined_call_operand.vmem [shape: bf16[50,30], index: 12, kind: input, shape index: {}]   ;;  %s1754_s11 = inlined_call_operand.vmem [shape: f32[1,50], index: 11, kind: input, shape index: {}]   ;;  %s1755_s16 = inlined_call_operand.<no memory space> [shape: f32[1,1], index: 16, kind: input, shape index: {}]   ;;  %s1756_s14 = inlined_call_operand.vmem [shape: f32[1,30], index: 14, kind: input, shape index: {}]   ;;  %s1757_s15 = inlined_call_operand.vmem [shape: f32[1,30], index: 15, kind: input, shape index: {}]   ;;  %s1758_s17 = inlined_call_operand.vmem [shape: f32[1,1,8], index: 17, kind: output, shape index: {}]  }
   0x1   :  { %1760 = sst [smem:[#allocation3_spill]] %s1741_s2  ;;  %122 = vmatprep.mubr.bf16.mxu1 %v1313_v1  ;;  %1205 = vset.pattern.permute.xlu0 %v1313_v1  ;;  %v60_v4 = vld [vmem:[%s1743_s1] sm:$0xff]  ;;  %v1214_v8 = vld [vmem:[%s1744_s4 + $0x14] ss:$8 sps:$4 sm:$0xff]   ;;  %v1212_v9 = vld [vmem:[%s1744_s4 + $0x10] ss:$8 sps:$4 sm:$0xff]  }
   0x2   :  { %1761 = sst [smem:[#allocation4_spill]] %s1742_s0  ;;  %s1762_s26 = sld [smem:[#allocation3_spill]]  ;;  %v1209_v6 = vld [vmem:[%s1744_s4] ss:$8 sps:$4 sm:$0xff]   ;;  %v1211_v7 = vld [vmem:[%s1744_s4 + $0x4] ss:$8 sps:$4 sm:$0xff]  }
   0x3   :  { %s1763_s30 = sld [smem:[#allocation4_spill]]  ;;  %v1217_v10 = vld [vmem:[%s1744_s4 + $0x24] ss:$8 sps:$4 sm:$0xff]   ;;  %v1215_v11 = vld [vmem:[%s1744_s4 + $0x20] ss:$8 sps:$4 sm:$0xff]   ;;  %v1562_v56 = vshrl.u32 %v66_v55, 7 }
   0x4   :  { %v1220_v12 = vld [vmem:[%s1744_s4 + $0x34] ss:$8 sps:$4 sm:$0xff]   ;;  %v1218_v13 = vld [vmem:[%s1744_s4 + $0x30] ss:$8 sps:$4 sm:$0xff]   ;;  %v1223_v14 = vld [vmem:[%s1744_s4 + $0x44] ss:$8 sps:$4 sm:$0xff]  }
   0x5   :  { %v1221_v15 = vld [vmem:[%s1744_s4 + $0x40] ss:$8 sps:$4 sm:$0xff]   ;;  %v1226_v16 = vld [vmem:[%s1744_s4 + $0x54] ss:$8 sps:$4 sm:$0xff]   ;;  %v1224_v17 = vld [vmem:[%s1744_s4 + $0x50] ss:$8 sps:$4 sm:$0xff]  }
   0x6   :  { %v1229_v18 = vld [vmem:[%s1744_s4 + $0x64] ss:$8 sps:$4 sm:$0xff]   ;;  %v1227_v19 = vld [vmem:[%s1744_s4 + $0x60] ss:$8 sps:$4 sm:$0xff]   ;;  %v1232_v20 = vld [vmem:[%s1744_s4 + $0x74] ss:$8 sps:$4 sm:$0xff]  }
   0x7   :  { %v1230_v21 = vld [vmem:[%s1744_s4 + $0x70] ss:$8 sps:$4 sm:$0xff]   ;;  %v1235_v22 = vld [vmem:[%s1744_s4 + $0x84] ss:$8 sps:$4 sm:$0xff]   ;;  %v1233_v23 = vld [vmem:[%s1744_s4 + $0x80] ss:$8 sps:$4 sm:$0xff]  }
   0x8   :  { %v1206_v0 = vld [vmem:[%s1762_s26 + $0x4] ss:$8 sps:$4 sm:$0xff]   ;;  %v1208_v2 = vld [vmem:[%s1762_s26] ss:$8 sps:$4 sm:$0xff]   ;;  %v1238_v24 = vld [vmem:[%s1744_s4 + $0x94] ss:$8 sps:$4 sm:$0xff]  }
   0x9   :  { %v59_v3 = vld [vmem:[%s1763_s30] sm:$0xff]  ;;  %90 = vmatprep.subr.bf16.mxu1 %v1206_v0  ;;  %v1236_v25 = vld [vmem:[%s1744_s4 + $0x90] ss:$8 sps:$4 sm:$0xff]   ;;  %v1244_v28 = vld [vmem:[%s1744_s4 + $0xb4] ss:$8 sps:$4 sm:$0xff]   ;;  %v1565_v57 = vsub.s32 0, %v1562_v56 }
   0xa   :  { %v61_v5 = vpack.c.bf16 %v60_v4, %v59_v3  ;;  %91 = vmatpush1.bf16.msra.mxu1 %v1208_v2  ;;  %v1241_v26 = vld [vmem:[%s1744_s4 + $0xa4] ss:$8 sps:$4 sm:$0xff]   ;;  %v1239_v27 = vld [vmem:[%s1744_s4 + $0xa0] ss:$8 sps:$4 sm:$0xff]   ;;  %v1242_v29 = vld [vmem:[%s1744_s4 + $0xb0] ss:$8 sps:$4 sm:$0xff]  }
   0xb   :  { %312 = vmatprep.subr.bf16.mxu1 %v1211_v7  ;;  %v163_v30 = vld [vmem:[%s1744_s4 + $0xc0] sm:$0xff]  ;;  %v1250_v36 = vld [vmem:[%s1745_s6 + $0x14] ss:$8 sps:$4 sm:$0xff]   ;;  %v1252_v37 = vld [vmem:[%s1745_s6 + $0x10] ss:$8 sps:$4 sm:$0xff]   ;;  %v1571_v59 = vsub.s32 1, %v1562_v56 }
   0xc   :  { %v1075_v31 = vcombine.high %v163_v30, %v163_v30  ;;  %v1074_v32 = vcombine.low %v163_v30, %v163_v30  ;;  %v1247_v34 = vld [vmem:[%s1745_s6 + $0x4] ss:$8 sps:$4 sm:$0xff]   ;;  %v1249_v35 = vld [vmem:[%s1745_s6] ss:$8 sps:$4 sm:$0xff]   ;;  %v1256_v40 = vld [vmem:[%s1745_s6 + $0x34] ss:$8 sps:$4 sm:$0xff]  }
   0xd   :  { %1049 = vmatmul.mubr.msk.bf16.vlgmr.msra.gmra.mrb[0].mxu1 %vm86_vm0, %v61_v5  ;;  %532 = vmatprep.subr.bf16.mxu0 %v1247_v34  ;;  %v1253_v38 = vld [vmem:[%s1745_s6 + $0x24] ss:$8 sps:$4 sm:$0xff]   ;;  %v1255_v39 = vld [vmem:[%s1745_s6 + $0x20] ss:$8 sps:$4 sm:$0xff]   ;;  %v1258_v41 = vld [vmem:[%s1745_s6 + $0x30] ss:$8 sps:$4 sm:$0xff]  }
   0xe   :  { %313 = vmatpush1.bf16.msra.mxu1 %v1209_v6  ;;  %v307_v33 = vsel %vm305_vm1, %v1074_v32, 0  ;;  %533 = vmatpush1.bf16.msra.mxu0 %v1249_v35  ;;  %v1259_v42 = vld [vmem:[%s1745_s6 + $0x44] ss:$8 sps:$4 sm:$0xff]   ;;  %v1261_v43 = vld [vmem:[%s1745_s6 + $0x40] ss:$8 sps:$4 sm:$0xff]   ;;  %vm301_vm2 = vcmask 588800  }
   0xf   :  { %314 = vmatprep.subr.bf16.mxu1 %v1214_v8  ;;  %534 = vmatprep.subr.bf16.mxu0 %v1250_v36  ;;  %v1262_v44 = vld [vmem:[%s1745_s6 + $0x54] ss:$8 sps:$4 sm:$0xff]   ;;  %v1264_v45 = vld [vmem:[%s1745_s6 + $0x50] ss:$8 sps:$4 sm:$0xff]   ;;  %v1265_v46 = vld [vmem:[%s1745_s6 + $0x64] ss:$8 sps:$4 sm:$0xff]  }
  0x10   :  { %v1267_v47 = vld [vmem:[%s1745_s6 + $0x60] ss:$8 sps:$4 sm:$0xff]   ;;  %v1268_v48 = vld [vmem:[%s1745_s6 + $0x74] ss:$8 sps:$4 sm:$0xff]   ;;  %v1270_v49 = vld [vmem:[%s1745_s6 + $0x70] ss:$8 sps:$4 sm:$0xff]  }
  0x11   :  { %v1271_v50 = vld [vmem:[%s1745_s6 + $0x84] ss:$8 sps:$4 sm:$0xff]   ;;  %v1273_v51 = vld [vmem:[%s1745_s6 + $0x80] ss:$8 sps:$4 sm:$0xff]   ;;  %v1274_v52 = vld [vmem:[%s1745_s6 + $0x94] ss:$8 sps:$4 sm:$0xff]  }
  0x12   :  { %315 = vmatpush1.bf16.msra.mxu1 %v1212_v9  ;;  %535 = vmatpush1.bf16.msra.mxu0 %v1252_v37  ;;  %v1276_v53 = vld [vmem:[%s1745_s6 + $0x90] ss:$8 sps:$4 sm:$0xff]   ;;  %v1277_v54 = vld [vmem:[%s1745_s6 + $0xa4] ss:$8 sps:$4 sm:$0xff]   ;;  %v64_v58 = vld [vmem:[%s1746_s3] sm:$0x3] }
  0x13   :  { %316 = vmatprep.subr.bf16.mxu1 %v1217_v10  ;;  %536 = vmatprep.subr.bf16.mxu0 %v1253_v38  ;;  %v69_v60 = vrot.slane %v64_v58, %v1565_v57  ;;  %v73_v61 = vrot.slane %v64_v58, %v1571_v59  ;;  %v164_v30 = vld [vmem:[%s1748_s5] sm:$0x3]  ;;  %vm801_vm3 = vcmask 1041408   ;;  %vm1315_vm4 = vmmov 0  }
  0x14   :  { %v173_v32 = vrot.slane %v164_v30, %v1571_v59  ;;  %v1302_v58 = vld [vmem:[%s1749_s10 + $0x20] sm:$0xff]   ;;  %vm797_vm5 = vcmask 818176   ;;  %vm890_vm6 = vcmask 1040384   ;;  %vm886_vm7 = vcmask 408576  }
  0x15   :  { %vm1018_vm8 = vcmask 244736   ;;  %vm1041_vm9 = vcmask 57344  }
  0x16   :  { %317 = vmatpush1.bf16.msra.mxu1 %v1215_v11  ;;  %537 = vmatpush1.bf16.msra.mxu0 %v1255_v39 }
  0x17   :  { %318 = vmatprep.subr.bf16.mxu1 %v1220_v12  ;;  %538 = vmatprep.subr.bf16.mxu0 %v1256_v40 }
  0x1a   :  { %319 = vmatpush1.bf16.msra.mxu1 %v1218_v13  ;;  %539 = vmatpush1.bf16.msra.mxu0 %v1258_v41  ;;  %v1279_v13 = vld [vmem:[%s1745_s6 + $0xa0] ss:$8 sps:$4 sm:$0xff]  }
  0x1b   :  { %320 = vmatprep.subr.bf16.mxu1 %v1223_v14  ;;  %540 = vmatprep.subr.bf16.mxu0 %v1259_v42  ;;  %v1280_v14 = vld [vmem:[%s1745_s6 + $0xb4] ss:$8 sps:$4 sm:$0xff]  }
  0x1e   :  { %321 = vmatpush1.bf16.msra.mxu1 %v1221_v15  ;;  %541 = vmatpush1.bf16.msra.mxu0 %v1261_v43  ;;  %v1282_v15 = vld [vmem:[%s1745_s6 + $0xb0] ss:$8 sps:$4 sm:$0xff]  }
  0x1f   :  { %322 = vmatprep.subr.bf16.mxu1 %v1226_v16  ;;  %542 = vmatprep.subr.bf16.mxu0 %v1262_v44  ;;  %v385_v16 = vld [vmem:[%s1745_s6 + $0xc0] sm:$0xff] }
  0x22   :  { %323 = vmatpush1.bf16.msra.mxu1 %v1224_v17  ;;  %543 = vmatpush1.bf16.msra.mxu0 %v1264_v45  ;;  %v1103_v17 = vcombine.high %v385_v16, %v385_v16 }
  0x23   :  { %324 = vmatprep.subr.bf16.mxu1 %v1229_v18  ;;  %544 = vmatprep.subr.bf16.mxu0 %v1265_v46  ;;  %v1102_v18 = vcombine.low %v385_v16, %v385_v16  ;;  %v1106_v16 = vld [vmem:[%s1752_s9] ss:$0 sm:$0xff] }
  0x26   :  { %325 = vmatpush1.bf16.msra.mxu1 %v1227_v19  ;;  %545 = vmatpush1.bf16.msra.mxu0 %v1267_v47  ;;  %v527_v19 = vsel %vm305_vm1, %v1102_v18, 0  ;;  %v1295_v47 = vld [vmem:[%s1747_s8 + $0x50] sm:$0xff]  }
  0x27   :  { %326 = vmatprep.subr.bf16.mxu1 %v1232_v20  ;;  %546 = vmatprep.subr.bf16.mxu0 %v1268_v48  ;;  %v1285_v20 = vld [vmem:[%s1747_s8] sm:$0xff]   ;;  %v1296_v48 = vld [vmem:[%s1747_s8 + $0x58] sm:$0xff]  }
  0x2a   :  { %327 = vmatpush1.bf16.msra.mxu1 %v1230_v21  ;;  %547 = vmatpush1.bf16.msra.mxu0 %v1270_v49  ;;  %v1286_v21 = vld [vmem:[%s1747_s8 + $0x8] sm:$0xff]   ;;  %v1297_v49 = vld [vmem:[%s1747_s8 + $0x60] ss:$0 sps:$4 sm:$0xff]  }
  0x2b   :  { %328 = vmatprep.subr.bf16.mxu1 %v1235_v22  ;;  %548 = vmatprep.subr.bf16.mxu0 %v1271_v50  ;;  %v1287_v22 = vld [vmem:[%s1747_s8 + $0x10] sm:$0xff]   ;;  %v692_v50 = vsel %vm305_vm1, %v1297_v49, 0 }
  0x2e   :  { %329 = vmatpush1.bf16.msra.mxu1 %v1233_v23  ;;  %549 = vmatpush1.bf16.msra.mxu0 %v1273_v51  ;;  %v1288_v23 = vld [vmem:[%s1747_s8 + $0x18] sm:$0xff]   ;;  %v1314_v51 = vmov 0.0  }
  0x2f   :  { %330 = vmatprep.subr.bf16.mxu1 %v1238_v24  ;;  %550 = vmatprep.subr.bf16.mxu0 %v1274_v52  ;;  %v1289_v24 = vld [vmem:[%s1747_s8 + $0x20] sm:$0xff]  }
  0x30   :  { %v1298_v52 = vld [vmem:[%s1749_s10] sm:$0xff]  }
  0x32   :  { %331 = vmatpush1.bf16.msra.mxu1 %v1236_v25  ;;  %551 = vmatpush1.bf16.msra.mxu0 %v1276_v53  ;;  %v1290_v25 = vld [vmem:[%s1747_s8 + $0x28] sm:$0xff]  }
  0x33   :  { %332 = vmatprep.subr.bf16.mxu1 %v1241_v26  ;;  %552 = vmatprep.subr.bf16.mxu0 %v1277_v54  ;;  %v1291_v26 = vld [vmem:[%s1747_s8 + $0x30] sm:$0xff]   ;;  %v1299_v53 = vld [vmem:[%s1749_s10 + $0x8] sm:$0xff]   ;;  %v1301_v54 = vld [vmem:[%s1749_s10 + $0x18] sm:$0xff]  }
  0x36   :  { %333 = vmatpush1.bf16.msra.mxu1 %v1239_v27  ;;  %553 = vmatpush1.bf16.msra.mxu0 %v1279_v13  ;;  %v1292_v27 = vld [vmem:[%s1747_s8 + $0x38] sm:$0xff]  }
  0x37   :  { %334 = vmatprep.subr.bf16.mxu1 %v1244_v28  ;;  %554 = vmatprep.subr.bf16.mxu0 %v1280_v14  ;;  %v1293_v28 = vld [vmem:[%s1747_s8 + $0x40] sm:$0xff]   ;;  %v1304_v14 = vld [vmem:[%s1749_s10 + $0x30] ss:$0 sps:$4 sm:$0x33]  }
  0x3a   :  { %335 = vmatpush1.bf16.msra.mxu1 %v1242_v29  ;;  %555 = vmatpush1.bf16.msra.mxu0 %v1282_v15  ;;  %v1294_v29 = vld [vmem:[%s1747_s8 + $0x48] sm:$0xff]   ;;  %v803_v15 = vsel %vm801_vm3, %v1304_v14, 0 }
  0x3b   :  { %1076 = vmatprep.subr.msk.bf16.mxu1 %vm305_vm1, %v1075_v31  ;;  %1104 = vmatprep.subr.msk.bf16.mxu0 %vm305_vm1, %v1103_v17  ;;  %v169_v31 = vrot.slane %v164_v30, %v1565_v57 }
  0x3e   :  { %337 = vmatpush1.bf16.msra.mxu1 %v307_v33  ;;  %557 = vmatpush1.bf16.msra.mxu0 %v527_v19 }
  0x3f   :  { %694 = vmatprep.subr.bf16.mxu1 %v1313_v1  ;;  %1160 = vmatprep.subr.bf16.mxu0 %v1314_v51 }
  0xe0   :  { %v124_v62 = vpop.f32.mrb[0].mxu1 }
  0xe1   :  { %v125_v63 = vadd.f32 %v124_v62, %v69_v60  ;;  %v126_v0 = vpop.f32.mrb[1].mxu1 }
  0xe2   :  { %v127_v2 = vadd.f32 %v126_v0, %v73_v61  ;;  %v128_v3 = vpop.f32.mrb[2].mxu1 }
  0xe3   :  { %v129_v4 = vadd.f32 %v128_v3, %v69_v60  ;;  %v130_v5 = vpop.f32.mrb[3].mxu1  ;;  %v133_v7 = vmax.f32 %v125_v63, 0.0  ;;  %v386_v60 = vld [vmem:[%s1750_s7] sm:$0x3] }
  0xe4   :  { %v131_v6 = vadd.f32 %v130_v5, %v73_v61  ;;  %v134_v9 = vmax.f32 %v127_v2, 0.0  ;;  %v391_v61 = vrot.slane %v386_v60, %v1565_v57  ;;  %v395_v62 = vrot.slane %v386_v60, %v1571_v59  ;;  %v1303_v59 = vld [vmem:[%s1749_s10 + $0x28] sm:$0xff]  }
  0xe5   :  { %v135_v8 = vmax.f32 %v129_v4, 0.0 }
  0xe6   :  { %v136_v10 = vmax.f32 %v131_v6, 0.0 }
  0xe7   :  { %v137_v11 = vpack.c.bf16 %v135_v8, %v133_v7 }
  0xe8   :  { %v138_v12 = vpack.c.bf16 %v136_v10, %v134_v9 }
  0xea   :  { %1077 = vmatprep.mubr.msk.bf16.mxu1 %vm301_vm2, %v138_v12 }
  0xeb   :  { %345 = vmatmul.mubr.bf16.vlgmr.msra.gmra.mrb[4].mxu1 %v137_v11 }
  0xec   :  { %695 = vmatpush1.bf16.msra.mxu1 %v1285_v20 }
  0xed   :  { %696 = vmatprep.subr.bf16.mxu1 %v1313_v1 }
  0xf0   :  { %697 = vmatpush1.bf16.msra.mxu1 %v1286_v21 }
  0xf1   :  { %698 = vmatprep.subr.bf16.mxu1 %v1313_v1 }
  0xf4   :  { %699 = vmatpush1.bf16.msra.mxu1 %v1287_v22 }
  0xf5   :  { %700 = vmatprep.subr.bf16.mxu1 %v1313_v1 }
  0xf8   :  { %701 = vmatpush1.bf16.msra.mxu1 %v1288_v23 }
  0xf9   :  { %702 = vmatprep.subr.bf16.mxu1 %v1313_v1 }
  0xfc   :  { %703 = vmatpush1.bf16.msra.mxu1 %v1289_v24 }
  0xfd   :  { %704 = vmatprep.subr.bf16.mxu1 %v1313_v1 }
 0x100   :  { %705 = vmatpush1.bf16.msra.mxu1 %v1290_v25  ;;  %v1305_v25 = vld [vmem:[%s1751_s13] sm:$0xff]  }
 0x101   :  { %706 = vmatprep.subr.bf16.mxu1 %v1313_v1 }
 0x104   :  { %707 = vmatpush1.bf16.msra.mxu1 %v1291_v26 }
 0x105   :  { %708 = vmatprep.subr.bf16.mxu1 %v1313_v1 }
 0x108   :  { %709 = vmatpush1.bf16.msra.mxu1 %v1292_v27  ;;  %v1306_v27 = vld [vmem:[%s1751_s13 + $0x8] sm:$0xff]  }
 0x109   :  { %710 = vmatprep.subr.bf16.mxu1 %v1313_v1 }
 0x10c   :  { %711 = vmatpush1.bf16.msra.mxu1 %v1293_v28  ;;  %v1307_v28 = vld [vmem:[%s1751_s13 + $0x10] sm:$0xff]  }
 0x10d   :  { %712 = vmatprep.subr.bf16.mxu1 %v1313_v1 }
 0x110   :  { %713 = vmatpush1.bf16.msra.mxu1 %v1294_v29  ;;  %v1308_v29 = vld [vmem:[%s1751_s13 + $0x18] ss:$0 sps:$4 sm:$0x11]  }
 0x111   :  { %714 = vmatprep.subr.bf16.mxu1 %v1313_v1  ;;  %v892_v30 = vsel %vm890_vm6, %v1308_v29, 0 }
 0x114   :  { %715 = vmatpush1.bf16.msra.mxu1 %v1295_v47  ;;  %v22_v47 = vstv %s1755_s16 }
 0x115   :  { %716 = vmatprep.subr.bf16.mxu1 %v1313_v1  ;;  %23 = vst [vmem:[#allocation2] sm:$0x1] %v22_v47 }
 0x118   :  { %717 = vmatpush1.bf16.msra.mxu1 %v1296_v48 }
 0x119   :  { %718 = vmatprep.subr.bf16.mxu1 %v1313_v1  ;;  %v1300_v1 = vld [vmem:[%s1749_s10 + $0x10] sm:$0xff]  }
 0x11c   :  { %719 = vmatpush1.bf16.msra.mxu1 %v692_v50 }
 0x1be   :  { %v346_v33 = vpop.f32.mrb[4].mxu1 }
 0x1bf   :  { %v347_v34 = vadd.f32 %v346_v33, %v169_v31  ;;  %v348_v35 = vpop.f32.mrb[5].mxu1  ;;  %v1121_v33 = vld [vmem:[%s1754_s11] ss:$0 sm:$0xff] }
 0x1c0   :  { %v349_v36 = vadd.f32 %v348_v35, %v173_v32  ;;  %v350_v37 = vpop.f32.mrb[6].mxu1 }
 0x1c1   :  { %v351_v38 = vadd.f32 %v350_v37, %v169_v31  ;;  %v352_v39 = vpop.f32.mrb[7].mxu1  ;;  %v355_v41 = vmax.f32 %v347_v34, 0.0  ;;  %v1312_v31 = vld [vmem:[%s1753_s12 + $0x18] ss:$0 sps:$4 sm:$0x11]  }
 0x1c2   :  { %v353_v40 = vadd.f32 %v352_v39, %v173_v32  ;;  %v356_v43 = vmax.f32 %v349_v36, 0.0  ;;  %v959_v32 = vsel %vm890_vm6, %v1312_v31, 0 }
 0x1c3   :  { %v357_v42 = vmax.f32 %v351_v38, 0.0 }
 0x1c4   :  { %v358_v44 = vmax.f32 %v353_v40, 0.0 }
 0x1c5   :  { %v359_v45 = vpack.c.bf16 %v357_v42, %v355_v41 }
 0x1c6   :  { %v360_v46 = vpack.c.bf16 %v358_v44, %v356_v43  ;;  %v1309_v43 = vld [vmem:[%s1753_s12] sm:$0xff]  }
 0x1c8   :  { %1105 = vmatprep.mubr.msk.bf16.mxu0 %vm301_vm2, %v360_v46  ;;  %v1311_v46 = vld [vmem:[%s1753_s12 + $0x10] sm:$0xff]  }
 0x1c9   :  { %565 = vmatmul.mubr.bf16.vlgmr.msra.gmra.mrb[0].mxu0 %v359_v45  ;;  %v1310_v45 = vld [vmem:[%s1753_s12 + $0x8] sm:$0xff]  }
 0x1ca   :  { %1161 = vmatpush3.bf16.msra.mxu0 %v1298_v52  ;;  %1174 = vmatprep.mubr.msk.bf16.mxu0 %vm1315_vm4, %v1314_v51 }
 0x1cb   :  { %1162 = vmatprep.subr.bf16.mxu0 %v1314_v51 }
 0x1ce   :  { %1163 = vmatpush3.bf16.msra.mxu0 %v1299_v53 }
 0x1cf   :  { %1164 = vmatprep.subr.bf16.mxu0 %v1314_v51 }
 0x1d2   :  { %1165 = vmatpush3.bf16.msra.mxu0 %v1300_v1  ;;  %v1140_v1 = vld [vmem:[%s1756_s14] ss:$0 sm:$0xff] }
 0x1d3   :  { %1166 = vmatprep.subr.bf16.mxu0 %v1314_v51 }
 0x1d6   :  { %1167 = vmatpush3.bf16.msra.mxu0 %v1301_v54 }
 0x1d7   :  { %1168 = vmatprep.subr.bf16.mxu0 %v1314_v51 }
 0x1da   :  { %1169 = vmatpush3.bf16.msra.mxu0 %v1302_v58 }
 0x1db   :  { %1170 = vmatprep.subr.bf16.mxu0 %v1314_v51 }
 0x1de   :  { %1171 = vmatpush3.bf16.msra.mxu0 %v1303_v59 }
 0x1df   :  { %1172 = vmatprep.subr.bf16.mxu0 %v1314_v51 }
 0x1e2   :  { %1173 = vmatpush3.bf16.msra.mxu0 %v803_v15 }
 0x1e3   :  { %1178 = vmatprep.subr.bf16.mxu0 %v1314_v51 }
 0x29c   :  { %v566_v63 = vpop.f32.mrb[0].mxu0 }
 0x29d   :  { %v567_v0 = vadd.f32 %v566_v63, %v391_v61  ;;  %v568_v2 = vpop.f32.mrb[1].mxu0 }
 0x29e   :  { %v569_v3 = vadd.f32 %v568_v2, %v395_v62  ;;  %v570_v4 = vpop.f32.mrb[2].mxu0 }
 0x29f   :  { %v571_v5 = vadd.f32 %v570_v4, %v391_v61  ;;  %v572_v6 = vpop.f32.mrb[3].mxu0  ;;  %v575_v8 = vmax.f32 %v567_v0, 0.0 }
 0x2a0   :  { %v573_v7 = vadd.f32 %v572_v6, %v395_v62  ;;  %v576_v10 = vmax.f32 %v569_v3, 0.0  ;;  %v1141_v62 = vld [vmem:[%s1757_s15] ss:$0 sm:$0xff] }
 0x2a1   :  { %v577_v9 = vmax.f32 %v571_v5, 0.0  ;;  %v1022_v3 = vld [vmem:[#allocation2] sm:$0x1]  ;;  %v1035_v5 = vand.u32 127, %v66_v55 }
 0x2a2   :  { %v578_v11 = vmax.f32 %v573_v7, 0.0 }
 0x2a3   :  { %v579_v12 = vpack.c.bf16 %v577_v9, %v575_v8  ;;  %v1038_v7 = vsub.s32 %v1035_v5, %v1562_v56 }
 0x2a4   :  { %v580_v13 = vpack.c.bf16 %v578_v11, %v576_v10 }
 0x2a6   :  { %1120 = vmatprep.mubr.msk.bf16.mxu1 %vm301_vm2, %v580_v13 }
 0x2a7   :  { %727 = vmatmul.mubr.bf16.vlgmr.msra.gmra.mrb[8].mxu1 %v579_v12 }
 0x37a   :  { %v728_v17 = vpop.f32.mrb[8].mxu1 }
 0x37b   :  { %v729_v18 = vadd.f32 %v1106_v16, %v728_v17  ;;  %v730_v19 = vpop.f32.mrb[9].mxu1 }
 0x37c   :  { %v731_v20 = vpop.f32.mrb[10].mxu1 }
 0x37d   :  { %v732_v21 = vadd.f32 %v1106_v16, %v731_v20  ;;  %v733_v22 = vpop.f32.mrb[11].mxu1  ;;  %v735_v23 = vmax.f32 %v729_v18, 0.0 }
 0x37f   :  { %v736_v24 = vmax.f32 %v732_v21, 0.0 }
 0x381   :  { %v737_v26 = vpack.c.bf16 %v736_v24, %v735_v23 }
 0x383   :  { %1175 = vmatmul.mubr.msk.bf16.vlgmr.msra.gmra.mrb[4].mxu0 %vm797_vm5, %v737_v26 }
 0x384   :  { %1179 = vmatpush3.bf16.msra.mxu0 %v1305_v25  ;;  %1186 = vmatprep.mubr.msk.bf16.mxu0 %vm1315_vm4, %v1314_v51 }
 0x385   :  { %1180 = vmatprep.subr.bf16.mxu0 %v1314_v51 }
 0x388   :  { %1181 = vmatpush3.bf16.msra.mxu0 %v1306_v27 }
 0x389   :  { %1182 = vmatprep.subr.bf16.mxu0 %v1314_v51 }
 0x38c   :  { %1183 = vmatpush3.bf16.msra.mxu0 %v1307_v28 }
 0x38d   :  { %1184 = vmatprep.subr.bf16.mxu0 %v1314_v51 }
 0x390   :  { %1185 = vmatpush3.bf16.msra.mxu0 %v892_v30 }
 0x391   :  { %1190 = vmatprep.subr.bf16.mxu0 %v1314_v51 }
 0x456   :  { %v839_v34 = vpop.f32.mrb[4].mxu0 }
 0x457   :  { %v840_v35 = vadd.f32 %v1121_v33, %v839_v34  ;;  %v1176_v36 = vpop.f32.mrb[5].mxu0 }
 0x458   :  { %v842_v37 = vpop.f32.mrb[6].mxu0 }
 0x459   :  { %v843_v38 = vadd.f32 %v1121_v33, %v842_v37  ;;  %v1177_v39 = vpop.f32.mrb[7].mxu0  ;;  %v846_v40 = vmax.f32 %v840_v35, 0.0 }
 0x45b   :  { %v847_v41 = vmax.f32 %v843_v38, 0.0 }
 0x45d   :  { %v848_v42 = vpack.c.bf16 %v847_v41, %v846_v40 }
 0x45f   :  { %v864_v44 = vrot.slane %v848_v42, 4 }
 0x461   :  { %1187 = vmatmul.mubr.msk.bf16.vlgmr.msra.gmra.mrb[8].mxu0 %vm886_vm7, %v864_v44 }
 0x462   :  { %1191 = vmatpush3.bf16.msra.mxu0 %v1309_v43  ;;  %1198 = vmatprep.mubr.msk.bf16.mxu0 %vm1315_vm4, %v1314_v51 }
 0x463   :  { %1192 = vmatprep.subr.bf16.mxu0 %v1314_v51 }
 0x466   :  { %1193 = vmatpush3.bf16.msra.mxu0 %v1310_v45 }
 0x467   :  { %1194 = vmatprep.subr.bf16.mxu0 %v1314_v51 }
 0x46a   :  { %1195 = vmatpush3.bf16.msra.mxu0 %v1311_v46 }
 0x46b   :  { %1196 = vmatprep.subr.bf16.mxu0 %v1314_v51 }
 0x46e   :  { %1197 = vmatpush3.bf16.msra.mxu0 %v959_v32 }
 0x471   :  { %1199 = vmatmul.mubr.msk.bf16.vlgmr.msra.gmra.mrb[12].mxu0 %vm886_vm7, %v848_v42 }
 0x534   :  { %v928_v48 = vpop.f32.mrb[8].mxu0 }
 0x535   :  { %v1188_v49 = vpop.f32.mrb[9].mxu0 }
 0x536   :  { %v931_v50 = vpop.f32.mrb[10].mxu0 }
 0x537   :  { %v1189_v52 = vpop.f32.mrb[11].mxu0 }
 0x544   :  { %v995_v53 = vpop.f32.mrb[12].mxu0 }
 0x545   :  { %v996_v54 = vadd.f32 %v995_v53, %v928_v48  ;;  %v1200_v58 = vpop.f32.mrb[13].mxu0 }
 0x546   :  { %v998_v60 = vpop.f32.mrb[14].mxu0 }
 0x547   :  { %v1008_v51 = vadd.f32 %v1140_v1, %v996_v54  ;;  %v1201_v61 = vpop.f32.mrb[15].mxu0 }
 0x549   :  { %v1009_v63 = vmax.f32 %v1008_v51, 0.0 }
 0x54b   :  { %v1017_v0 = vmul.f32 %v1141_v62, %v1009_v63 }
 0x54d   :  { %v1019_v2 = vsel %vm1018_vm8, %v1017_v0, 0.0 }
 0x54e   :  { %1020 = vadd.xlane.f32.xlu0 %v1019_v2 }
 0x564   :  { %1025 = vperm.xlu0 %1205, %v1022_v3  }
 0x5db   :  { %v1021_v4 = vpop.xlane.xlu0 %1020 }
 0x5e3   :  { %v1026_v6 = vpop.permute.xlu0 %1025 }
 0x5e4   :  { %v1031_v8 = vrot.slane %v1026_v6, %v1565_v57 }
 0x5e6   :  { %v1032_v9 = vadd.f32 %v1031_v8, %v1021_v4 }
 0x5e8   :  { %v1039_v10 = vrot.slane %v1032_v9, %v1038_v7 }
 0x5ea   :  { %1042 = vst.msk [vmem:[%s1758_s17] sm:$0x1] %vm1041_vm9, %v1039_v10 }

</bundles_post_ra>
